<compile_context>
chip_gen: v7x
topology: tpu7x:2x2x1
jax: 0.10.0
libtpu: 0.0.40
codegen_flags: <defaults>
</compile_context>

<pallas_src>
import functools

import jax
import jax.numpy as jnp
from jax.experimental import pallas as pl
from jax.experimental.pallas import tpu as pltpu


def _round_up(x: int, m: int) -> int:
    return ((x + m - 1) // m) * m


def _padded_dims(input_dim: int, output_dim: int) -> tuple[int, int]:
    # Lane-align the per-degree blocks only when input_dim is already large;
    # tiny layers (I < 128) are EUP/VPU bound and the extra MXU work from
    # padding is not worth it.
    i_pad = _round_up(input_dim, 128) if input_dim >= 128 else input_dim
    o_pad = _round_up(output_dim, 128)
    return i_pad, o_pad


def fuse_chebykan_coeffs(coeffs, *, matmul_dtype):
    """(I, O, D+1) -> degree-major, padded ((D+1)*I_pad, O_pad) matrix.

    Row block d*I_pad + i holds the degree-d coefficient of input feature i
    (zero rows for padded features / zero columns for padded outputs),
    matching the in-kernel P layout.  Call once per parameter update and pass
    the result as `fused_weight=` to chebykan_forward to avoid re-doing the
    transpose/pad/cast on every step.
    """
    input_dim, output_dim, d1 = coeffs.shape
    i_pad, o_pad = _padded_dims(input_dim, output_dim)
    w = jnp.transpose(coeffs, (2, 0, 1))                       # (D+1, I, O)
    w = jnp.pad(w, ((0, 0), (0, i_pad - input_dim), (0, o_pad - output_dim)))
    return w.reshape(d1 * i_pad, o_pad).astype(matmul_dtype)


# ----------------------------------------------------------------------------
# Kernels
# ----------------------------------------------------------------------------

def _chebykan_fused_kernel(x_ref, w_ref, o_ref, p_ref, *, degree, poly_type):
    """Fused-K path: write P into VMEM scratch (matmul dtype), one MXU dot.

    x_ref: (tm, I_pad)                input rows
    w_ref: ((D+1)*I_pad, O_pad)       resident fused coefficients
    o_ref: (tm, O_pad)                output rows (lane-dense)
    p_ref: (tm, (D+1)*I_pad) scratch  Chebyshev feature block, matmul dtype
    """
    i_pad = x_ref.shape[1]
    mdt = p_ref.dtype
    # tanh + recurrence in f32 (v5e VPU/EUP have no bf16 path).
    x = jnp.tanh(x_ref[...].astype(jnp.float32))
    ones = jnp.ones_like(x)
    p_ref[:, 0:i_pad] = ones.astype(mdt)
    if degree >= 1:
        x2 = x + x                                   # hoisted 2*x
        prev2 = ones
        prev = x2 if poly_type == "U" else x         # U_1 = 2x, T_1 = x
        p_ref[:, i_pad:2 * i_pad] = prev.astype(mdt)
        for n in range(2, degree + 1):
            cur = x2 * prev - prev2                  # P_n = 2x P_{n-1} - P_{n-2}
            p_ref[:, n * i_pad:(n + 1) * i_pad] = cur.astype(mdt)
            prev2, prev = prev, cur
    o_ref[...] = jnp.dot(
        p_ref[...], w_ref[...], preferred_element_type=jnp.float32
    ).astype(o_ref.dtype)


def _chebykan_accum_kernel(x_ref, w_ref, o_ref, *, degree, poly_type):
    """Accumulate path (large input_dim): D+1 dots into an f32 accumulator."""
    i_pad = x_ref.shape[1]
    mdt = w_ref.dtype
    x = jnp.tanh(x_ref[...].astype(jnp.float32))
    ones = jnp.ones_like(x)
    acc = jnp.dot(ones.astype(mdt), w_ref[0:i_pad, :],
                  preferred_element_type=jnp.float32)
    if degree >= 1:
        x2 = x + x
        prev2 = ones
        prev = x2 if poly_type == "U" else x
        acc += jnp.dot(prev.astype(mdt), w_ref[i_pad:2 * i_pad, :],
                       preferred_element_type=jnp.float32)
        for n in range(2, degree + 1):
            cur = x2 * prev - prev2
            acc += jnp.dot(cur.astype(mdt),
                           w_ref[n * i_pad:(n + 1) * i_pad, :],
                           preferred_element_type=jnp.float32)
            prev2, prev = prev, cur
    o_ref[...] = acc.astype(o_ref.dtype)


# ----------------------------------------------------------------------------
# Tiling / VMEM budget
# ----------------------------------------------------------------------------

def _vmem_capacity_bytes() -> int:
    try:
        cap = getattr(pltpu.get_tpu_info(), "vmem_capacity_bytes", None)
        if cap:
            return int(cap)
    except Exception:
        pass
    return 64 * 1024 * 1024        # conservative default (v7x per-TensorCore)


def _choose_row_tile(rows, i_pad, o_pad, degree, x_bytes, m_bytes, w_bytes,
                     vmem_limit, tm_cap, use_accum):
    """Largest row tile (multiple of 8, <= tm_cap) fitting the VMEM budget."""
    per_row = (2 * i_pad * x_bytes          # input tile, double-buffered
               + 2 * o_pad * x_bytes        # output tile, double-buffered
               + o_pad * 4                  # f32 dot result / accumulator
               + 4 * i_pad * 4)             # f32 x, 2x, prev, prev2 carries
    if not use_accum:
        per_row += (degree + 1) * i_pad * m_bytes   # P scratch (matmul dtype)
    # ~70% of the limit as headroom; count the resident weight twice in case
    # the single-buffer request is ignored and it stays double-buffered.
    budget = int(vmem_limit * 0.7) - 2 * w_bytes
    tm = max(budget // max(per_row, 1), 8)
    tm = min(tm, tm_cap, _round_up(rows, 8))
    tm -= tm % 8
    return max(tm, 8)


# ----------------------------------------------------------------------------
# Forward wrapper
# ----------------------------------------------------------------------------

def chebykan_forward(x, coeffs, *, degree, poly_type="U", fused_weight=None,
                     matmul_dtype=None, tm_max=None, accum_k_threshold=256):
    """ChebyKANLayer forward: tanh(x) -> Chebyshev features -> einsum w/ coeffs.

    x: (..., input_dim); coeffs: (input_dim, output_dim, degree+1).
    """
    input_dim, output_dim, d1 = coeffs.shape
    assert d1 == degree + 1
    assert x.shape[-1] == input_dim
    assert poly_type in ("T", "U")

    matmul_dtype = jnp.dtype(matmul_dtype or x.dtype)
    i_pad, o_pad = _padded_dims(input_dim, output_dim)

    if fused_weight is None:
        fused_weight = fuse_chebykan_coeffs(coeffs, matmul_dtype=matmul_dtype)
    w = fused_weight
    assert w.shape == ((degree + 1) * i_pad, o_pad), "fused_weight shape mismatch"
    if w.dtype != matmul_dtype:
        w = w.astype(matmul_dtype)

    lead_shape = x.shape[:-1]
    rows = 1
    for s in lead_shape:
        rows *= s
    x2d = x.reshape(rows, input_dim)

    use_accum = input_dim >= accum_k_threshold

    # Generation-aware VMEM limit and row-tile cap.
    phys_vmem = _vmem_capacity_bytes()
    vmem_limit = min(int(phys_vmem * 0.75), 112 * 1024 * 1024)
    tm_cap = 512 if phys_vmem >= 128 * 1024 * 1024 else 256
    if tm_max is not None:
        tm_cap = min(tm_cap, int(tm_max))

    x_bytes = jnp.dtype(x.dtype).itemsize
    m_bytes = matmul_dtype.itemsize
    w_bytes = w.size * m_bytes
    tm = _choose_row_tile(rows, i_pad, o_pad, degree, x_bytes, m_bytes,
                          w_bytes, vmem_limit, tm_cap, use_accum)

    # Pad rows up to a multiple of tm (pad rows yield garbage that is sliced
    # off below) and lane-align the feature dimension when requested.
    padded_rows = _round_up(rows, tm)
    if padded_rows != rows or i_pad != input_dim:
        x2d = jnp.pad(x2d, ((0, padded_rows - rows), (0, i_pad - input_dim)))

    if use_accum:
        kernel = functools.partial(_chebykan_accum_kernel, degree=degree,
                                   poly_type=poly_type)
        scratch_shapes = []
    else:
        kernel = functools.partial(_chebykan_fused_kernel, degree=degree,
                                   poly_type=poly_type)
        scratch_shapes = [pltpu.VMEM((tm, (degree + 1) * i_pad), matmul_dtype)]

    w_shape = ((degree + 1) * i_pad, o_pad)
    out_shape = jax.ShapeDtypeStruct((padded_rows, o_pad), x.dtype)

    def _run(single_buffered_weight: bool):
        if single_buffered_weight:
            # Constant index_map -> never re-fetched; one buffer is enough.
            w_spec = pl.BlockSpec(w_shape, lambda i: (0, 0),
                                  pipeline_mode=pl.Buffered(1))
        else:
            w_spec = pl.BlockSpec(w_shape, lambda i: (0, 0))
        return pl.pallas_call(
            kernel,
            out_shape=out_shape,
            grid_spec=pltpu.PrefetchScalarGridSpec(
                num_scalar_prefetch=0,
                grid=(padded_rows // tm,),
                in_specs=[
                    pl.BlockSpec((tm, i_pad), lambda i: (i, 0)),
                    w_spec,
                ],
                out_specs=pl.BlockSpec((tm, o_pad), lambda i: (i, 0)),
                scratch_shapes=scratch_shapes,
            ),
            compiler_params=pltpu.CompilerParams(
                dimension_semantics=("parallel",),
                vmem_limit_bytes=vmem_limit,
            ),
        )(x2d, w)

    try:
        out = _run(True)
    except Exception:
        # JAX/Mosaic without single-buffered BlockSpec support: fall back to
        # the default double-buffered resident weight.
        out = _run(False)

    out = out[:rows, :output_dim]
    return out.reshape(*lead_shape, output_dim)


# ----------------------------------------------------------------------------
# Init + pure-JAX reference
# ----------------------------------------------------------------------------

def init_coeffs_xavier(key, input_dim: int, output_dim: int, degree: int):
    """Matches torch.nn.init.xavier_uniform_ on a (I, O, D+1) tensor:
    fan_in = O*(D+1), fan_out = I*(D+1), bound = sqrt(6/(fan_in+fan_out))."""
    fan_in = output_dim * (degree + 1)
    fan_out = input_dim * (degree + 1)
    bound = (6.0 / (fan_in + fan_out)) ** 0.5
    return jax.random.uniform(
        key, (input_dim, output_dim, degree + 1),
        minval=-bound, maxval=bound, dtype=jnp.float32)


def chebykan_reference(x, coeffs, *, degree: int, poly_type: str):
    xt = jnp.tanh(x)
    polys = [jnp.ones_like(xt)]
    if degree >= 1:
        polys.append(2.0 * xt if poly_type == "U" else xt)
    for n in range(2, degree + 1):
        polys.append(2.0 * xt * polys[-1] - polys[-2])
    P = jnp.stack(polys, axis=-1)  # (..., I, D+1)
    return jnp.einsum("...id,iod->...o", P, coeffs)


if __name__ == "__main__":
    key = jax.random.PRNGKey(0)
    k_x, k_w = jax.random.split(key)

    batch, seq = 2, 8
    input_dim, output_dim, degree = 32, 16, 4

    x = jax.random.normal(k_x, (batch, seq, input_dim), dtype=jnp.float32)
    coeffs = init_coeffs_xavier(k_w, input_dim, output_dim, degree)

    # Default ('U') path, fused-scratch kernel, with a precomputed fused weight.
    fused_w = fuse_chebykan_coeffs(coeffs, matmul_dtype=x.dtype)
    out = chebykan_forward(x, coeffs, degree=degree, poly_type="U",
                           fused_weight=fused_w)
    out = jax.block_until_ready(out)
    ref = chebykan_reference(x, coeffs, degree=degree, poly_type="U")
    assert out.shape == (batch, seq, output_dim)
    assert jnp.allclose(out, ref, atol=1e-4, rtol=1e-4), "U-branch mismatch"

    # 'T' branch + a row count that is not tile-aligned.
    x_odd = jax.random.normal(k_x, (3, 7, input_dim), dtype=jnp.float32)
    out_t = jax.block_until_ready(
        chebykan_forward(x_odd, coeffs, degree=degree, poly_type="T"))
    ref_t = chebykan_reference(x_odd, coeffs, degree=degree, poly_type="T")
    assert jnp.allclose(out_t, ref_t, atol=1e-4, rtol=1e-4), "T-branch mismatch"

    # Exercise the per-degree accumulate kernel (large-input_dim path) by
    # lowering its threshold.
    out_a = jax.block_until_ready(
        chebykan_forward(x, coeffs, degree=degree, poly_type="U",
                         accum_k_threshold=1))
    assert jnp.allclose(out_a, ref, atol=1e-4, rtol=1e-4), "accum-path mismatch"

    print("KERNEL_OK")
</pallas_src>

<mosaic_0001>
module attributes {stable_mosaic.version = 11 : i64} {
  func.func @_chebykan_fused_kernel(%arg0: i32, %arg1: memref<16x32xf32, #tpu.memory_space<vmem>>, %arg2: memref<160x128xf32, #tpu.memory_space<vmem>>, %arg3: memref<16x128xf32, #tpu.memory_space<vmem>>, %arg4: memref<16x160xf32, #tpu.memory_space<vmem>>) attributes {dimension_semantics = [#tpu.dimension_semantics<parallel>], iteration_bounds = array<i64: 1>, scalar_prefetch = 0 : i64, scratch_operands = 1 : i64, tpu.core_type = #tpu.core_type<tc>, window_params = [{transform_indices = @transform_0, window_bounds = array<i64: 16, 32>}, {pipeline_mode = #tpu.pipeline_mode<synchronous>, transform_indices = @transform_1, window_bounds = array<i64: 160, 128>}, {transform_indices = @transform_2, window_bounds = array<i64: 16, 128>}]} {
    %c0 = arith.constant 0 : index
    %c0_0 = arith.constant 0 : index
    %0 = vector.load %arg1[%c0, %c0_0] : memref<16x32xf32, #tpu.memory_space<vmem>>, vector<16x32xf32>
    %1 = math.tanh %0 : vector<16x32xf32>
    %cst = arith.constant 1.000000e+00 : f32
    %2 = vector.broadcast %cst : f32 to vector<16x32xf32>
    %c0_1 = arith.constant 0 : index
    %c0_2 = arith.constant 0 : index
    %3 = vector.load %arg4[%c0_1, %c0_2] : memref<16x160xf32, #tpu.memory_space<vmem>>, vector<16x32xf32>
    tpu.vector_store %arg4[%c0_1, %c0_2], %2 {strides = array<i32>} : memref<16x160xf32, #tpu.memory_space<vmem>>, vector<16x32xf32>,
    %4 = arith.addf %1, %1 : vector<16x32xf32>
    %c0_3 = arith.constant 0 : index
    %c32 = arith.constant 32 : index
    %5 = vector.load %arg4[%c0_3, %c32] : memref<16x160xf32, #tpu.memory_space<vmem>>, vector<16x32xf32>
    tpu.vector_store %arg4[%c0_3, %c32], %4 {strides = array<i32>} : memref<16x160xf32, #tpu.memory_space<vmem>>, vector<16x32xf32>,
    %6 = arith.mulf %4, %4 : vector<16x32xf32>
    %7 = arith.subf %6, %2 : vector<16x32xf32>
    %c0_4 = arith.constant 0 : index
    %c64 = arith.constant 64 : index
    %8 = vector.load %arg4[%c0_4, %c64] : memref<16x160xf32, #tpu.memory_space<vmem>>, vector<16x32xf32>
    tpu.vector_store %arg4[%c0_4, %c64], %7 {strides = array<i32>} : memref<16x160xf32, #tpu.memory_space<vmem>>, vector<16x32xf32>,
    %9 = arith.mulf %4, %7 : vector<16x32xf32>
    %10 = arith.subf %9, %4 : vector<16x32xf32>
    %c0_5 = arith.constant 0 : index
    %c96 = arith.constant 96 : index
    %11 = vector.load %arg4[%c0_5, %c96] : memref<16x160xf32, #tpu.memory_space<vmem>>, vector<16x32xf32>
    tpu.vector_store %arg4[%c0_5, %c96], %10 {strides = array<i32>} : memref<16x160xf32, #tpu.memory_space<vmem>>, vector<16x32xf32>,
    %12 = arith.mulf %4, %10 : vector<16x32xf32>
    %13 = arith.subf %12, %7 : vector<16x32xf32>
    %c0_6 = arith.constant 0 : index
    %c128 = arith.constant 128 : index
    %14 = vector.load %arg4[%c0_6, %c128] : memref<16x160xf32, #tpu.memory_space<vmem>>, vector<16x32xf32>
    tpu.vector_store %arg4[%c0_6, %c128], %13 {strides = array<i32>} : memref<16x160xf32, #tpu.memory_space<vmem>>, vector<16x32xf32>,
    %c0_7 = arith.constant 0 : index
    %c0_8 = arith.constant 0 : index
    %15 = vector.load %arg4[%c0_7, %c0_8] : memref<16x160xf32, #tpu.memory_space<vmem>>, vector<16x160xf32>
    %c0_9 = arith.constant 0 : index
    %c0_10 = arith.constant 0 : index
    %16 = vector.load %arg2[%c0_9, %c0_10] : memref<160x128xf32, #tpu.memory_space<vmem>>, vector<160x128xf32>
    %cst_11 = arith.constant dense<0.000000e+00> : vector<16x128xf32>
    %17 = tpu.matmul %15, %16, %cst_11 {dimension_numbers = #tpu.dot_dimension_numbers<[1], [0], [0], [1], [0, 0, 1, 1], [], []>} : vector<16x160xf32>, vector<160x128xf32>, vector<16x128xf32> -> vector<16x128xf32>
    %c0_12 = arith.constant 0 : index
    %c0_13 = arith.constant 0 : index
    %18 = vector.load %arg3[%c0_12, %c0_13] : memref<16x128xf32, #tpu.memory_space<vmem>>, vector<16x128xf32>
    tpu.vector_store %arg3[%c0_12, %c0_13], %17 {strides = array<i32>} : memref<16x128xf32, #tpu.memory_space<vmem>>, vector<16x128xf32>,
    return
  }
  func.func @transform_0(%arg0: i32) -> (i32, i32) {
    %c0_i32 = arith.constant 0 : i32
    %c0_i32_0 = arith.constant 0 : i32
    return %arg0, %c0_i32 : i32, i32
  }
  func.func @transform_1(%arg0: i32) -> (i32, i32) {
    %c0_i32 = arith.constant 0 : i32
    %c0_i32_0 = arith.constant 0 : i32
    %c0_i32_1 = arith.constant 0 : i32
    return %c0_i32, %c0_i32_0 : i32, i32
  }
  func.func @transform_2(%arg0: i32) -> (i32, i32) {
    %c0_i32 = arith.constant 0 : i32
    %c0_i32_0 = arith.constant 0 : i32
    return %arg0, %c0_i32 : i32, i32
  }
}

module attributes {stable_mosaic.version = 11 : i64} {
  func.func @_chebykan_fused_kernel(%arg0: i32, %arg1: memref<16x32xf32, #tpu.memory_space<vmem>>, %arg2: memref<160x128xf32, #tpu.memory_space<vmem>>, %arg3: memref<16x128xf32, #tpu.memory_space<vmem>>, %arg4: memref<16x160xf32, #tpu.memory_space<vmem>>) attributes {dimension_semantics = [#tpu.dimension_semantics<parallel>], iteration_bounds = array<i64: 1>, scalar_prefetch = 0 : i64, scratch_operands = 1 : i64, tpu.core_type = #tpu.core_type<tc>, window_params = [{transform_indices = @transform_0, window_bounds = array<i64: 16, 32>}, {pipeline_mode = #tpu.pipeline_mode<synchronous>, transform_indices = @transform_1, window_bounds = array<i64: 160, 128>}, {transform_indices = @transform_2, window_bounds = array<i64: 16, 128>}]} {
    %c0 = arith.constant 0 : index
    %c0_0 = arith.constant 0 : index
    %0 = vector.load %arg1[%c0, %c0_0] : memref<16x32xf32, #tpu.memory_space<vmem>>, vector<16x32xf32>
    %1 = math.tanh %0 : vector<16x32xf32>
    %cst = arith.constant 1.000000e+00 : f32
    %2 = vector.broadcast %cst : f32 to vector<16x32xf32>
    %c0_1 = arith.constant 0 : index
    %c0_2 = arith.constant 0 : index
    %3 = vector.load %arg4[%c0_1, %c0_2] : memref<16x160xf32, #tpu.memory_space<vmem>>, vector<16x32xf32>
    tpu.vector_store %arg4[%c0_1, %c0_2], %2 {strides = array<i32>} : memref<16x160xf32, #tpu.memory_space<vmem>>, vector<16x32xf32>,
    %4 = arith.addf %1, %1 : vector<16x32xf32>
    %c0_3 = arith.constant 0 : index
    %c32 = arith.constant 32 : index
    %5 = vector.load %arg4[%c0_3, %c32] : memref<16x160xf32, #tpu.memory_space<vmem>>, vector<16x32xf32>
    tpu.vector_store %arg4[%c0_3, %c32], %4 {strides = array<i32>} : memref<16x160xf32, #tpu.memory_space<vmem>>, vector<16x32xf32>,
    %6 = arith.mulf %4, %4 : vector<16x32xf32>
    %7 = arith.subf %6, %2 : vector<16x32xf32>
    %c0_4 = arith.constant 0 : index
    %c64 = arith.constant 64 : index
    %8 = vector.load %arg4[%c0_4, %c64] : memref<16x160xf32, #tpu.memory_space<vmem>>, vector<16x32xf32>
    tpu.vector_store %arg4[%c0_4, %c64], %7 {strides = array<i32>} : memref<16x160xf32, #tpu.memory_space<vmem>>, vector<16x32xf32>,
    %9 = arith.mulf %4, %7 : vector<16x32xf32>
    %10 = arith.subf %9, %4 : vector<16x32xf32>
    %c0_5 = arith.constant 0 : index
    %c96 = arith.constant 96 : index
    %11 = vector.load %arg4[%c0_5, %c96] : memref<16x160xf32, #tpu.memory_space<vmem>>, vector<16x32xf32>
    tpu.vector_store %arg4[%c0_5, %c96], %10 {strides = array<i32>} : memref<16x160xf32, #tpu.memory_space<vmem>>, vector<16x32xf32>,
    %12 = arith.mulf %4, %10 : vector<16x32xf32>
    %13 = arith.subf %12, %7 : vector<16x32xf32>
    %c0_6 = arith.constant 0 : index
    %c128 = arith.constant 128 : index
    %14 = vector.load %arg4[%c0_6, %c128] : memref<16x160xf32, #tpu.memory_space<vmem>>, vector<16x32xf32>
    tpu.vector_store %arg4[%c0_6, %c128], %13 {strides = array<i32>} : memref<16x160xf32, #tpu.memory_space<vmem>>, vector<16x32xf32>,
    %c0_7 = arith.constant 0 : index
    %c0_8 = arith.constant 0 : index
    %15 = vector.load %arg4[%c0_7, %c0_8] : memref<16x160xf32, #tpu.memory_space<vmem>>, vector<16x160xf32>
    %c0_9 = arith.constant 0 : index
    %c0_10 = arith.constant 0 : index
    %16 = vector.load %arg2[%c0_9, %c0_10] : memref<160x128xf32, #tpu.memory_space<vmem>>, vector<160x128xf32>
    %cst_11 = arith.constant dense<0.000000e+00> : vector<16x128xf32>
    %17 = tpu.matmul %15, %16, %cst_11 {dimension_numbers = #tpu.dot_dimension_numbers<[1], [0], [0], [1], [0, 0, 1, 1], [], []>} : vector<16x160xf32>, vector<160x128xf32>, vector<16x128xf32> -> vector<16x128xf32>
    %c0_12 = arith.constant 0 : index
    %c0_13 = arith.constant 0 : index
    %18 = vector.load %arg3[%c0_12, %c0_13] : memref<16x128xf32, #tpu.memory_space<vmem>>, vector<16x128xf32>
    tpu.vector_store %arg3[%c0_12, %c0_13], %17 {strides = array<i32>} : memref<16x128xf32, #tpu.memory_space<vmem>>, vector<16x128xf32>,
    return
  }
  func.func @transform_0(%arg0: i32) -> (i32, i32) {
    %c0_i32 = arith.constant 0 : i32
    %c0_i32_0 = arith.constant 0 : i32
    return %arg0, %c0_i32 : i32, i32
  }
  func.func @transform_1(%arg0: i32) -> (i32, i32) {
    %c0_i32 = arith.constant 0 : i32
    %c0_i32_0 = arith.constant 0 : i32
    %c0_i32_1 = arith.constant 0 : i32
    return %c0_i32, %c0_i32_0 : i32, i32
  }
  func.func @transform_2(%arg0: i32) -> (i32, i32) {
    %c0_i32 = arith.constant 0 : i32
    %c0_i32_0 = arith.constant 0 : i32
    return %arg0, %c0_i32 : i32, i32
  }
}

</mosaic_0001>

<bundles_post_ra>
// kernel: tpu_custom_call.1
= control target key start
LH: loop header
LB: loop body
LE: loop exit
PB: predicated region body
PF: predicated region fallthrough
CT: control target
= control target key end

     0   :  { %7 = vsyncpa [#allocation4], 0  ;;  %s457_s0 = inlined_call_operand.hbm [shape: f32[16,32], index: 0, kind: input, shape index: {}]   ;;  %s458_s1 = inlined_call_operand.hbm [shape: f32[160,128], index: 1, kind: input, shape index: {}]   ;;  %s459_s2 = inlined_call_operand.hbm [shape: f32[16,128], index: 2, kind: output, shape index: {}]  }
   0x1   :  { %8 = vsyncpa [#allocation7], 0 }
   0x2   :  { %9 = vsyncpa [#allocation5], 0  ;;  %s361_s9 = smov [#allocation3]   ;;  %s289_s13 = scalar_lea.hbm %s457_s0, 256 }
   0x3   :  { %s15_s10 = sshll.u32 %s361_s9, 4  ;;  %p290_p0 = scmp.ne.s32.totalorder %s457_s0, %s289_s13  ;;  %s16_s10 = int_to_ptr.vmem [resolvable:$true] %s15_s10 }
   0x4   :  { %p293_p1 = scmp.lt.u32.totalorder %s289_s13, %s457_s0 }
   0x6   :  { %p295_p2 = pnand %p293_p1, %p290_p0 }
   0x8   :  { %298 = shalt.err (!%p295_p2)
}
   0x9   :  { %s299_s18 = scalar_lea.vmem %s16_s10, 256  ;;  %p304_p4 = scmp.lt.s32.totalorder %s16_s10, %s16_s10 }
   0xa   :  { %p300_p3 = scmp.ne.s32.totalorder %s16_s10, %s299_s18  ;;  %p305_p5 = scmp.lt.s32.totalorder %s299_s18, %s299_s18 }
   0xc   :  { %p306_p6 = por %p305_p5, %p304_p4 }
   0xe   :  { %p307_p7 = pnand %p306_p6, %p300_p3 }
  0x10   :  { %310 = shalt.err (!%p307_p7)
}
  0x11   :  { %s362_s19 = smov 128   ;;  %s363_s20 = smov 8  }
  0x12   :  { %21 = dma.hbm_to_vmem [thread:$0]  %s457_s0, 256, %s16_s10, [#allocation4], %s362_s19, %s362_s19, %s363_s20  }
  0x13   :  { %s364_s23 = smov [#allocation6]   ;;  %s311_s27 = scalar_lea.hbm %s458_s1, 2560 }
  0x14   :  { %s27_s24 = sshll.u32 %s364_s23, 4  ;;  %p312_p8 = scmp.ne.s32.totalorder %s458_s1, %s311_s27  ;;  %s28_s24 = int_to_ptr.vmem [resolvable:$true] %s27_s24 }
  0x15   :  { %p315_p9 = scmp.lt.u32.totalorder %s311_s27, %s458_s1 }
  0x17   :  { %p317_p10 = pnand %p315_p9, %p312_p8 }
  0x19   :  { %320 = shalt.err (!%p317_p10)
}
  0x1a   :  { %s321_s4 = scalar_lea.vmem %s28_s24, 2560  ;;  %p326_p12 = scmp.lt.s32.totalorder %s28_s24, %s28_s24 }
  0x1b   :  { %p322_p11 = scmp.ne.s32.totalorder %s28_s24, %s321_s4  ;;  %p327_p13 = scmp.lt.s32.totalorder %s321_s4, %s321_s4 }
  0x1d   :  { %p328_p0 = por %p327_p13, %p326_p12 }
  0x1f   :  { %p329_p1 = pnand %p328_p0, %p322_p11 }
  0x21   :  { %332 = shalt.err (!%p329_p1)
}
  0x22   :  { %33 = dma.hbm_to_vmem [thread:$0]  %s458_s1, 2560, %s28_s24, [#allocation7], %s362_s19, %s362_s19, %s363_s20  }
  0x23   :  { %355 = dma.done.wait [#allocation4], 256  }
  0x24   :  { %356 = vsyncadd [#allocation4], 4294967040 }
  0x25   :  { %357 = dma.done.wait [#allocation7], 2560  }
  0x26   :  { %358 = vsyncadd [#allocation7], 4294964736  ;;  %vm44_vm0 = vcmask 261120   ;;  %v365_v0 = vmov 0.0|0.0   ;;  %v366_v1 = vmov 1.0   ;;  %v40_v2 = vld [vmem:[#allocation3] sm:$0xff] }
  0x27   :  { %225 = vmatprep.subr.bf16.mxu0 %v365_v0  ;;  %255 = vmatprep.subr.bf16.mxu1 %v365_v0  ;;  %45 = vst.msk [vmem:[#allocation2] sm:$0xff] %vm44_vm0, %v366_v1  ;;  %46 = vst.msk [vmem:[#allocation2 + $0x10] sm:$0xff] %vm44_vm0, %v366_v1  ;;  %v41_v3 = vld [vmem:[#allocation3 + $0x8] sm:$0xff]  ;;  %v100_v4 = vld [vmem:[#allocation6] sm:$0xff]  ;;  %285 = vtanh.f32 %v40_v2  ;;  %s367_s1 = smov 32   ;;  %s368_s6 = smov 64  }
  0x28   :  { %v101_v5 = vld [vmem:[#allocation6 + $0x8] sm:$0xff]  ;;  %v102_v6 = vld [vmem:[#allocation6 + $0x10] sm:$0xff]  ;;  %v103_v7 = vld [vmem:[#allocation6 + $0x18] sm:$0xff]  ;;  %287 = vtanh.f32 %v41_v3  ;;  %s369_s7 = smov 96   ;;  %vm57_vm1 = vcmask 523520   ;;  %vm72_vm2 = vcmask 785920  }
  0x29   :  { %v226_v8 = vpack.c.bf16 %v101_v5, %v100_v4  ;;  %v229_v9 = vpack.c.bf16 %v103_v7, %v102_v6  ;;  %v104_v10 = vld [vmem:[#allocation6 + $0x20] sm:$0xff]  ;;  %v105_v11 = vld [vmem:[#allocation6 + $0x28] sm:$0xff]  ;;  %v106_v13 = vld [vmem:[#allocation6 + $0x30] sm:$0xff]  ;;  %vm87_vm3 = vcmask 1048320   ;;  %s370_s8 = smov [#allocation8]  }
  0x2a   :  { %v232_v12 = vpack.c.bf16 %v105_v11, %v104_v10  ;;  %v107_v14 = vld [vmem:[#allocation6 + $0x38] sm:$0xff]  ;;  %v108_v20 = vld [vmem:[#allocation6 + $0x40] sm:$0xff]  ;;  %v109_v21 = vld [vmem:[#allocation6 + $0x48] sm:$0xff]  ;;  %s208_s9 = sshll.u32 %s370_s8, 4  ;;  %s209_s9 = int_to_ptr.vmem [resolvable:$true] %s208_s9 }
  0x2b   :  { %227 = vmatpush1.bf16.msra.mxu0 %v226_v8  ;;  %265 = vmatpush1.bf16.msra.mxu1 %v226_v8  ;;  %v235_v18 = vpack.c.bf16 %v107_v14, %v106_v13  ;;  %v238_v25 = vpack.c.bf16 %v109_v21, %v108_v20  ;;  %v110_v27 = vld [vmem:[#allocation6 + $0x50] sm:$0xff]  ;;  %v111_v28 = vld [vmem:[#allocation6 + $0x58] sm:$0xff]  ;;  %v112_v34 = vld [vmem:[#allocation6 + $0x60] sm:$0xff]  ;;  %s333_s10 = scalar_lea.vmem %s209_s9, 256  ;;  %p338_p3 = scmp.lt.s32.totalorder %s209_s9, %s209_s9 }
  0x2c   :  { %228 = vmatprep.subr.bf16.mxu0 %v365_v0  ;;  %256 = vmatprep.subr.bf16.mxu1 %v365_v0  ;;  %v241_v32 = vpack.c.bf16 %v111_v28, %v110_v27  ;;  %v113_v35 = vld [vmem:[#allocation6 + $0x68] sm:$0xff]  ;;  %v114_v41 = vld [vmem:[#allocation6 + $0x70] sm:$0xff]  ;;  %v115_v42 = vld [vmem:[#allocation6 + $0x78] sm:$0xff]  ;;  %p334_p2 = scmp.ne.s32.totalorder %s209_s9, %s333_s10  ;;  %p339_p4 = scmp.lt.s32.totalorder %s333_s10, %s333_s10 }
  0x2d   :  { %v244_v39 = vpack.c.bf16 %v113_v35, %v112_v34  ;;  %v247_v43 = vpack.c.bf16 %v115_v42, %v114_v41  ;;  %v116_v44 = vld [vmem:[#allocation6 + $0x80] sm:$0xff]  ;;  %v117_v45 = vld [vmem:[#allocation6 + $0x88] sm:$0xff]  ;;  %v118_v47 = vld [vmem:[#allocation6 + $0x90] sm:$0xff] }
  0x2e   :  { %v250_v46 = vpack.c.bf16 %v117_v45, %v116_v44  ;;  %v119_v48 = vld [vmem:[#allocation6 + $0x98] sm:$0xff]  ;;  %p340_p5 = por %p339_p4, %p338_p3 }
  0x2f   :  { %230 = vmatpush1.bf16.msra.mxu0 %v229_v9  ;;  %266 = vmatpush1.bf16.msra.mxu1 %v229_v9  ;;  %v253_v51 = vpack.c.bf16 %v119_v48, %v118_v47 }
  0x30   :  { %231 = vmatprep.subr.bf16.mxu0 %v365_v0  ;;  %257 = vmatprep.subr.bf16.mxu1 %v365_v0  ;;  %p341_p6 = pnand %p340_p5, %p334_p2 }
  0x31   :  { %v286_v15 = vpop.eup %285 }
  0x32   :  { %v288_v16 = vpop.eup %287  ;;  %v47_v17 = vadd.f32 %v286_v15, %v286_v15 }
  0x33   :  { %233 = vmatpush1.bf16.msra.mxu0 %v232_v12  ;;  %267 = vmatpush1.bf16.msra.mxu1 %v232_v12  ;;  %v48_v19 = vadd.f32 %v288_v16, %v288_v16 }
  0x34   :  { %234 = vmatprep.subr.bf16.mxu0 %v365_v0  ;;  %258 = vmatprep.subr.bf16.mxu1 %v365_v0  ;;  %v60_v22 = vmul.f32 %v47_v17, %v47_v17 }
  0x35   :  { %51 = vrot.lane.b32.xlu0 %v47_v17, %s367_s1  ;;  %v61_v23 = vmul.f32 %v48_v19, %v48_v19 }
  0x36   :  { %v221_v24 = vadd.f32 -1.0, %v60_v22 }
  0x37   :  { %236 = vmatpush1.bf16.msra.mxu0 %v235_v18  ;;  %268 = vmatpush1.bf16.msra.mxu1 %v235_v18  ;;  %v222_v26 = vadd.f32 -1.0, %v61_v23 }
  0x38   :  { %237 = vmatprep.subr.bf16.mxu0 %v365_v0  ;;  %259 = vmatprep.subr.bf16.mxu1 %v365_v0  ;;  %v75_v29 = vmul.f32 %v221_v24, %v47_v17 }
  0x39   :  { %66 = vrot.lane.b32.xlu1 %v221_v24, %s368_s6  ;;  %53 = vrot.lane.b32.xlu0 %v48_v19, %s367_s1  ;;  %v76_v30 = vmul.f32 %v222_v26, %v48_v19 }
  0x3a   :  { %v77_v31 = vsub.f32 %v75_v29, %v47_v17 }
  0x3b   :  { %239 = vmatpush1.bf16.msra.mxu0 %v238_v25  ;;  %269 = vmatpush1.bf16.msra.mxu1 %v238_v25  ;;  %v78_v33 = vsub.f32 %v76_v30, %v48_v19 }
  0x3c   :  { %240 = vmatprep.subr.bf16.mxu0 %v365_v0  ;;  %260 = vmatprep.subr.bf16.mxu1 %v365_v0  ;;  %v90_v36 = vmul.f32 %v77_v31, %v47_v17 }
  0x3d   :  { %68 = vrot.lane.b32.xlu1 %v222_v26, %s368_s6  ;;  %81 = vrot.lane.b32.xlu0 %v77_v31, %s369_s7  ;;  %v91_v37 = vmul.f32 %v78_v33, %v48_v19 }
  0x3e   :  { %v92_v38 = vsub.f32 %v90_v36, %v221_v24 }
  0x3f   :  { %242 = vmatpush1.bf16.msra.mxu0 %v241_v32  ;;  %270 = vmatpush1.bf16.msra.mxu1 %v241_v32  ;;  %v93_v40 = vsub.f32 %v91_v37, %v222_v26 }
  0x40   :  { %243 = vmatprep.subr.bf16.mxu0 %v365_v0  ;;  %261 = vmatprep.subr.bf16.mxu1 %v365_v0  ;;  %94 = vst.msk [vmem:[#allocation2 + $0x8] sm:$0xff] %vm44_vm0, %v92_v38 }
  0x41   :  { %83 = vrot.lane.b32.xlu1 %v78_v33, %s369_s7  ;;  %95 = vst.msk [vmem:[#allocation2 + $0x18] sm:$0xff] %vm44_vm0, %v93_v40 }
  0x43   :  { %245 = vmatpush1.bf16.msra.mxu0 %v244_v39  ;;  %271 = vmatpush1.bf16.msra.mxu1 %v244_v39 }
  0x44   :  { %246 = vmatprep.subr.bf16.mxu0 %v365_v0  ;;  %262 = vmatprep.subr.bf16.mxu1 %v365_v0 }
  0x47   :  { %248 = vmatpush1.bf16.msra.mxu0 %v247_v43  ;;  %272 = vmatpush1.bf16.msra.mxu1 %v247_v43  ;;  %v97_v49 = vld [vmem:[#allocation2 + $0x8] sm:$0xff] }
  0x48   :  { %249 = vmatprep.subr.bf16.mxu0 %v365_v0  ;;  %263 = vmatprep.subr.bf16.mxu1 %v365_v0  ;;  %v99_v50 = vld [vmem:[#allocation2 + $0x18] sm:$0xff] }
  0x49   :  { %223 = vmatprep.mubr.msk.f32.mxu0 %vm44_vm0, %v97_v49  ;;  %224 = vmatprep.mubr.msk.f32.mxu1 %vm44_vm0, %v99_v50 }
  0x4b   :  { %251 = vmatpush1.bf16.msra.mxu0 %v250_v46  ;;  %273 = vmatpush1.bf16.msra.mxu1 %v250_v46 }
  0x4c   :  { %252 = vmatprep.subr.bf16.mxu0 %v365_v0  ;;  %264 = vmatprep.subr.bf16.mxu1 %v365_v0 }
  0x4f   :  { %254 = vmatpush1.bf16.msra.mxu0 %v253_v51  ;;  %274 = vmatpush1.bf16.msra.mxu1 %v253_v51 }
  0xa7   :  { %v52_v52 = vpop.permute.xlu0 %51 }
  0xa8   :  { %58 = vst.msk [vmem:[#allocation2] sm:$0xff] %vm57_vm1, %v52_v52 }
  0xab   :  { %v67_v53 = vpop.permute.xlu1 %66  ;;  %v54_v54 = vpop.permute.xlu0 %53 }
  0xac   :  { %73 = vst.msk [vmem:[#allocation2] sm:$0xff] %vm72_vm2, %v67_v53 }
  0xad   :  { %59 = vst.msk [vmem:[#allocation2 + $0x10] sm:$0xff] %vm57_vm1, %v54_v54 }
  0xaf   :  { %v69_v55 = vpop.permute.xlu1 %68  ;;  %v82_v56 = vpop.permute.xlu0 %81 }
  0xb0   :  { %74 = vst.msk [vmem:[#allocation2 + $0x10] sm:$0xff] %vm72_vm2, %v69_v55 }
  0xb1   :  { %88 = vst.msk [vmem:[#allocation2] sm:$0xff] %vm87_vm3, %v82_v56 }
  0xb3   :  { %v84_v57 = vpop.permute.xlu1 %83 }
  0xb4   :  { %89 = vst.msk [vmem:[#allocation2 + $0x10] sm:$0xff] %vm87_vm3, %v84_v57 }
  0xb8   :  { %v96_v58 = vld [vmem:[#allocation2] sm:$0xff] }
  0xb9   :  { %191 = vmatmul.mubr.f32.vlgmr.msra.gmra.mrb[0].mxu0 %v96_v58 }
  0xbb   :  { %v98_v59 = vld [vmem:[#allocation2 + $0x10] sm:$0xff] }
  0xbc   :  { %196 = vmatmul.mubr.f32.vlgmr.msra.gmra.mrb[0].mxu1 %v98_v59 }
 0x18c   :  { %v192_v60 = vpop.f32.mrb[0].mxu0 }
 0x18d   :  { %201 = vst [vmem:[#allocation8] sm:$0xff] %v192_v60  ;;  %v194_v61 = vpop.f32.mrb[1].mxu0 }
 0x18f   :  { %v197_v62 = vpop.f32.mrb[0].mxu1 }
 0x190   :  { %202 = vst [vmem:[#allocation8 + $0x8] sm:$0xff] %v197_v62  ;;  %v199_v63 = vpop.f32.mrb[1].mxu1 }
 0x191   :  { %344 = shalt.err (!%p341_p6)
}
 0x192   :  { %s345_s13 = scalar_lea.hbm %s459_s2, 256 }
 0x193   :  { %p346_p7 = scmp.ne.s32.totalorder %s459_s2, %s345_s13  ;;  %p349_p8 = scmp.lt.u32.totalorder %s345_s13, %s459_s2 }
 0x195   :  { %p351_p9 = pnand %p349_p8, %p346_p7 }
 0x197   :  { %354 = shalt.err (!%p351_p9)
}
 0x198   :  { %214 = dma.vmem_to_hbm [thread:$0]  %s209_s9, 256, %s459_s2, [#allocation5], %s362_s19, %s362_s19, %s363_s20  }
 0x199   :  { %359 = dma.done.wait [#allocation5], 256  }
 0x19a   :  { %360 = vsyncadd [#allocation5], 4294967040 }
 0x19b   :  { %218 = vsyncpa [#allocation4], 1 }
 0x19c   :  { %219 = vsyncpa [#allocation7], 1 }
 0x19d   :  { %220 = vsyncpa [#allocation5], 1 }

// kernel: tpu_custom_call.1
= control target key start
LH: loop header
LB: loop body
LE: loop exit
PB: predicated region body
PF: predicated region fallthrough
CT: control target
= control target key end

     0   :  { %7 = vsyncpa [#allocation4], 0  ;;  %s457_s0 = inlined_call_operand.hbm [shape: f32[16,32], index: 0, kind: input, shape index: {}]   ;;  %s458_s1 = inlined_call_operand.hbm [shape: f32[160,128], index: 1, kind: input, shape index: {}]   ;;  %s459_s2 = inlined_call_operand.hbm [shape: f32[16,128], index: 2, kind: output, shape index: {}]  }
   0x1   :  { %8 = vsyncpa [#allocation7], 0 }
   0x2   :  { %9 = vsyncpa [#allocation5], 0  ;;  %s361_s9 = smov [#allocation3]   ;;  %s289_s13 = scalar_lea.hbm %s457_s0, 256 }
   0x3   :  { %s15_s10 = sshll.u32 %s361_s9, 4  ;;  %p290_p0 = scmp.ne.s32.totalorder %s457_s0, %s289_s13  ;;  %s16_s10 = int_to_ptr.vmem [resolvable:$true] %s15_s10 }
   0x4   :  { %p293_p1 = scmp.lt.u32.totalorder %s289_s13, %s457_s0 }
   0x6   :  { %p295_p2 = pnand %p293_p1, %p290_p0 }
   0x8   :  { %298 = shalt.err (!%p295_p2)
}
   0x9   :  { %s299_s18 = scalar_lea.vmem %s16_s10, 256  ;;  %p304_p4 = scmp.lt.s32.totalorder %s16_s10, %s16_s10 }
   0xa   :  { %p300_p3 = scmp.ne.s32.totalorder %s16_s10, %s299_s18  ;;  %p305_p5 = scmp.lt.s32.totalorder %s299_s18, %s299_s18 }
   0xc   :  { %p306_p6 = por %p305_p5, %p304_p4 }
   0xe   :  { %p307_p7 = pnand %p306_p6, %p300_p3 }
  0x10   :  { %310 = shalt.err (!%p307_p7)
}
  0x11   :  { %s362_s19 = smov 128   ;;  %s363_s20 = smov 8  }
  0x12   :  { %21 = dma.hbm_to_vmem [thread:$0]  %s457_s0, 256, %s16_s10, [#allocation4], %s362_s19, %s362_s19, %s363_s20  }
  0x13   :  { %s364_s23 = smov [#allocation6]   ;;  %s311_s27 = scalar_lea.hbm %s458_s1, 2560 }
  0x14   :  { %s27_s24 = sshll.u32 %s364_s23, 4  ;;  %p312_p8 = scmp.ne.s32.totalorder %s458_s1, %s311_s27  ;;  %s28_s24 = int_to_ptr.vmem [resolvable:$true] %s27_s24 }
  0x15   :  { %p315_p9 = scmp.lt.u32.totalorder %s311_s27, %s458_s1 }
  0x17   :  { %p317_p10 = pnand %p315_p9, %p312_p8 }
  0x19   :  { %320 = shalt.err (!%p317_p10)
}
  0x1a   :  { %s321_s4 = scalar_lea.vmem %s28_s24, 2560  ;;  %p326_p12 = scmp.lt.s32.totalorder %s28_s24, %s28_s24 }
  0x1b   :  { %p322_p11 = scmp.ne.s32.totalorder %s28_s24, %s321_s4  ;;  %p327_p13 = scmp.lt.s32.totalorder %s321_s4, %s321_s4 }
  0x1d   :  { %p328_p0 = por %p327_p13, %p326_p12 }
  0x1f   :  { %p329_p1 = pnand %p328_p0, %p322_p11 }
  0x21   :  { %332 = shalt.err (!%p329_p1)
}
  0x22   :  { %33 = dma.hbm_to_vmem [thread:$0]  %s458_s1, 2560, %s28_s24, [#allocation7], %s362_s19, %s362_s19, %s363_s20  }
  0x23   :  { %355 = dma.done.wait [#allocation4], 256  }
  0x24   :  { %356 = vsyncadd [#allocation4], 4294967040 }
  0x25   :  { %357 = dma.done.wait [#allocation7], 2560  }
  0x26   :  { %358 = vsyncadd [#allocation7], 4294964736  ;;  %vm44_vm0 = vcmask 261120   ;;  %v365_v0 = vmov 0.0|0.0   ;;  %v366_v1 = vmov 1.0   ;;  %v40_v2 = vld [vmem:[#allocation3] sm:$0xff] }
  0x27   :  { %225 = vmatprep.subr.bf16.mxu0 %v365_v0  ;;  %255 = vmatprep.subr.bf16.mxu1 %v365_v0  ;;  %45 = vst.msk [vmem:[#allocation2] sm:$0xff] %vm44_vm0, %v366_v1  ;;  %46 = vst.msk [vmem:[#allocation2 + $0x10] sm:$0xff] %vm44_vm0, %v366_v1  ;;  %v41_v3 = vld [vmem:[#allocation3 + $0x8] sm:$0xff]  ;;  %v100_v4 = vld [vmem:[#allocation6] sm:$0xff]  ;;  %285 = vtanh.f32 %v40_v2  ;;  %s367_s1 = smov 32   ;;  %s368_s6 = smov 64  }
  0x28   :  { %v101_v5 = vld [vmem:[#allocation6 + $0x8] sm:$0xff]  ;;  %v102_v6 = vld [vmem:[#allocation6 + $0x10] sm:$0xff]  ;;  %v103_v7 = vld [vmem:[#allocation6 + $0x18] sm:$0xff]  ;;  %287 = vtanh.f32 %v41_v3  ;;  %s369_s7 = smov 96   ;;  %vm57_vm1 = vcmask 523520   ;;  %vm72_vm2 = vcmask 785920  }
  0x29   :  { %v226_v8 = vpack.c.bf16 %v101_v5, %v100_v4  ;;  %v229_v9 = vpack.c.bf16 %v103_v7, %v102_v6  ;;  %v104_v10 = vld [vmem:[#allocation6 + $0x20] sm:$0xff]  ;;  %v105_v11 = vld [vmem:[#allocation6 + $0x28] sm:$0xff]  ;;  %v106_v13 = vld [vmem:[#allocation6 + $0x30] sm:$0xff]  ;;  %vm87_vm3 = vcmask 1048320   ;;  %s370_s8 = smov [#allocation8]  }
  0x2a   :  { %v232_v12 = vpack.c.bf16 %v105_v11, %v104_v10  ;;  %v107_v14 = vld [vmem:[#allocation6 + $0x38] sm:$0xff]  ;;  %v108_v20 = vld [vmem:[#allocation6 + $0x40] sm:$0xff]  ;;  %v109_v21 = vld [vmem:[#allocation6 + $0x48] sm:$0xff]  ;;  %s208_s9 = sshll.u32 %s370_s8, 4  ;;  %s209_s9 = int_to_ptr.vmem [resolvable:$true] %s208_s9 }
  0x2b   :  { %227 = vmatpush1.bf16.msra.mxu0 %v226_v8  ;;  %265 = vmatpush1.bf16.msra.mxu1 %v226_v8  ;;  %v235_v18 = vpack.c.bf16 %v107_v14, %v106_v13  ;;  %v238_v25 = vpack.c.bf16 %v109_v21, %v108_v20  ;;  %v110_v27 = vld [vmem:[#allocation6 + $0x50] sm:$0xff]  ;;  %v111_v28 = vld [vmem:[#allocation6 + $0x58] sm:$0xff]  ;;  %v112_v34 = vld [vmem:[#allocation6 + $0x60] sm:$0xff]  ;;  %s333_s10 = scalar_lea.vmem %s209_s9, 256  ;;  %p338_p3 = scmp.lt.s32.totalorder %s209_s9, %s209_s9 }
  0x2c   :  { %228 = vmatprep.subr.bf16.mxu0 %v365_v0  ;;  %256 = vmatprep.subr.bf16.mxu1 %v365_v0  ;;  %v241_v32 = vpack.c.bf16 %v111_v28, %v110_v27  ;;  %v113_v35 = vld [vmem:[#allocation6 + $0x68] sm:$0xff]  ;;  %v114_v41 = vld [vmem:[#allocation6 + $0x70] sm:$0xff]  ;;  %v115_v42 = vld [vmem:[#allocation6 + $0x78] sm:$0xff]  ;;  %p334_p2 = scmp.ne.s32.totalorder %s209_s9, %s333_s10  ;;  %p339_p4 = scmp.lt.s32.totalorder %s333_s10, %s333_s10 }
  0x2d   :  { %v244_v39 = vpack.c.bf16 %v113_v35, %v112_v34  ;;  %v247_v43 = vpack.c.bf16 %v115_v42, %v114_v41  ;;  %v116_v44 = vld [vmem:[#allocation6 + $0x80] sm:$0xff]  ;;  %v117_v45 = vld [vmem:[#allocation6 + $0x88] sm:$0xff]  ;;  %v118_v47 = vld [vmem:[#allocation6 + $0x90] sm:$0xff] }
  0x2e   :  { %v250_v46 = vpack.c.bf16 %v117_v45, %v116_v44  ;;  %v119_v48 = vld [vmem:[#allocation6 + $0x98] sm:$0xff]  ;;  %p340_p5 = por %p339_p4, %p338_p3 }
  0x2f   :  { %230 = vmatpush1.bf16.msra.mxu0 %v229_v9  ;;  %266 = vmatpush1.bf16.msra.mxu1 %v229_v9  ;;  %v253_v51 = vpack.c.bf16 %v119_v48, %v118_v47 }
  0x30   :  { %231 = vmatprep.subr.bf16.mxu0 %v365_v0  ;;  %257 = vmatprep.subr.bf16.mxu1 %v365_v0  ;;  %p341_p6 = pnand %p340_p5, %p334_p2 }
  0x31   :  { %v286_v15 = vpop.eup %285 }
  0x32   :  { %v288_v16 = vpop.eup %287  ;;  %v47_v17 = vadd.f32 %v286_v15, %v286_v15 }
  0x33   :  { %233 = vmatpush1.bf16.msra.mxu0 %v232_v12  ;;  %267 = vmatpush1.bf16.msra.mxu1 %v232_v12  ;;  %v48_v19 = vadd.f32 %v288_v16, %v288_v16 }
  0x34   :  { %234 = vmatprep.subr.bf16.mxu0 %v365_v0  ;;  %258 = vmatprep.subr.bf16.mxu1 %v365_v0  ;;  %v60_v22 = vmul.f32 %v47_v17, %v47_v17 }
  0x35   :  { %51 = vrot.lane.b32.xlu0 %v47_v17, %s367_s1  ;;  %v61_v23 = vmul.f32 %v48_v19, %v48_v19 }
  0x36   :  { %v221_v24 = vadd.f32 -1.0, %v60_v22 }
  0x37   :  { %236 = vmatpush1.bf16.msra.mxu0 %v235_v18  ;;  %268 = vmatpush1.bf16.msra.mxu1 %v235_v18  ;;  %v222_v26 = vadd.f32 -1.0, %v61_v23 }
  0x38   :  { %237 = vmatprep.subr.bf16.mxu0 %v365_v0  ;;  %259 = vmatprep.subr.bf16.mxu1 %v365_v0  ;;  %v75_v29 = vmul.f32 %v221_v24, %v47_v17 }
  0x39   :  { %66 = vrot.lane.b32.xlu1 %v221_v24, %s368_s6  ;;  %53 = vrot.lane.b32.xlu0 %v48_v19, %s367_s1  ;;  %v76_v30 = vmul.f32 %v222_v26, %v48_v19 }
  0x3a   :  { %v77_v31 = vsub.f32 %v75_v29, %v47_v17 }
  0x3b   :  { %239 = vmatpush1.bf16.msra.mxu0 %v238_v25  ;;  %269 = vmatpush1.bf16.msra.mxu1 %v238_v25  ;;  %v78_v33 = vsub.f32 %v76_v30, %v48_v19 }
  0x3c   :  { %240 = vmatprep.subr.bf16.mxu0 %v365_v0  ;;  %260 = vmatprep.subr.bf16.mxu1 %v365_v0  ;;  %v90_v36 = vmul.f32 %v77_v31, %v47_v17 }
  0x3d   :  { %68 = vrot.lane.b32.xlu1 %v222_v26, %s368_s6  ;;  %81 = vrot.lane.b32.xlu0 %v77_v31, %s369_s7  ;;  %v91_v37 = vmul.f32 %v78_v33, %v48_v19 }
  0x3e   :  { %v92_v38 = vsub.f32 %v90_v36, %v221_v24 }
  0x3f   :  { %242 = vmatpush1.bf16.msra.mxu0 %v241_v32  ;;  %270 = vmatpush1.bf16.msra.mxu1 %v241_v32  ;;  %v93_v40 = vsub.f32 %v91_v37, %v222_v26 }
  0x40   :  { %243 = vmatprep.subr.bf16.mxu0 %v365_v0  ;;  %261 = vmatprep.subr.bf16.mxu1 %v365_v0  ;;  %94 = vst.msk [vmem:[#allocation2 + $0x8] sm:$0xff] %vm44_vm0, %v92_v38 }
  0x41   :  { %83 = vrot.lane.b32.xlu1 %v78_v33, %s369_s7  ;;  %95 = vst.msk [vmem:[#allocation2 + $0x18] sm:$0xff] %vm44_vm0, %v93_v40 }
  0x43   :  { %245 = vmatpush1.bf16.msra.mxu0 %v244_v39  ;;  %271 = vmatpush1.bf16.msra.mxu1 %v244_v39 }
  0x44   :  { %246 = vmatprep.subr.bf16.mxu0 %v365_v0  ;;  %262 = vmatprep.subr.bf16.mxu1 %v365_v0 }
  0x47   :  { %248 = vmatpush1.bf16.msra.mxu0 %v247_v43  ;;  %272 = vmatpush1.bf16.msra.mxu1 %v247_v43  ;;  %v97_v49 = vld [vmem:[#allocation2 + $0x8] sm:$0xff] }
  0x48   :  { %249 = vmatprep.subr.bf16.mxu0 %v365_v0  ;;  %263 = vmatprep.subr.bf16.mxu1 %v365_v0  ;;  %v99_v50 = vld [vmem:[#allocation2 + $0x18] sm:$0xff] }
  0x49   :  { %223 = vmatprep.mubr.msk.f32.mxu0 %vm44_vm0, %v97_v49  ;;  %224 = vmatprep.mubr.msk.f32.mxu1 %vm44_vm0, %v99_v50 }
  0x4b   :  { %251 = vmatpush1.bf16.msra.mxu0 %v250_v46  ;;  %273 = vmatpush1.bf16.msra.mxu1 %v250_v46 }
  0x4c   :  { %252 = vmatprep.subr.bf16.mxu0 %v365_v0  ;;  %264 = vmatprep.subr.bf16.mxu1 %v365_v0 }
  0x4f   :  { %254 = vmatpush1.bf16.msra.mxu0 %v253_v51  ;;  %274 = vmatpush1.bf16.msra.mxu1 %v253_v51 }
  0xa7   :  { %v52_v52 = vpop.permute.xlu0 %51 }
  0xa8   :  { %58 = vst.msk [vmem:[#allocation2] sm:$0xff] %vm57_vm1, %v52_v52 }
  0xab   :  { %v67_v53 = vpop.permute.xlu1 %66  ;;  %v54_v54 = vpop.permute.xlu0 %53 }
  0xac   :  { %73 = vst.msk [vmem:[#allocation2] sm:$0xff] %vm72_vm2, %v67_v53 }
  0xad   :  { %59 = vst.msk [vmem:[#allocation2 + $0x10] sm:$0xff] %vm57_vm1, %v54_v54 }
  0xaf   :  { %v69_v55 = vpop.permute.xlu1 %68  ;;  %v82_v56 = vpop.permute.xlu0 %81 }
  0xb0   :  { %74 = vst.msk [vmem:[#allocation2 + $0x10] sm:$0xff] %vm72_vm2, %v69_v55 }
  0xb1   :  { %88 = vst.msk [vmem:[#allocation2] sm:$0xff] %vm87_vm3, %v82_v56 }
  0xb3   :  { %v84_v57 = vpop.permute.xlu1 %83 }
  0xb4   :  { %89 = vst.msk [vmem:[#allocation2 + $0x10] sm:$0xff] %vm87_vm3, %v84_v57 }
  0xb8   :  { %v96_v58 = vld [vmem:[#allocation2] sm:$0xff] }
  0xb9   :  { %191 = vmatmul.mubr.f32.vlgmr.msra.gmra.mrb[0].mxu0 %v96_v58 }
  0xbb   :  { %v98_v59 = vld [vmem:[#allocation2 + $0x10] sm:$0xff] }
  0xbc   :  { %196 = vmatmul.mubr.f32.vlgmr.msra.gmra.mrb[0].mxu1 %v98_v59 }
 0x18c   :  { %v192_v60 = vpop.f32.mrb[0].mxu0 }
 0x18d   :  { %201 = vst [vmem:[#allocation8] sm:$0xff] %v192_v60  ;;  %v194_v61 = vpop.f32.mrb[1].mxu0 }
 0x18f   :  { %v197_v62 = vpop.f32.mrb[0].mxu1 }
 0x190   :  { %202 = vst [vmem:[#allocation8 + $0x8] sm:$0xff] %v197_v62  ;;  %v199_v63 = vpop.f32.mrb[1].mxu1 }
 0x191   :  { %344 = shalt.err (!%p341_p6)
}
 0x192   :  { %s345_s13 = scalar_lea.hbm %s459_s2, 256 }
 0x193   :  { %p346_p7 = scmp.ne.s32.totalorder %s459_s2, %s345_s13  ;;  %p349_p8 = scmp.lt.u32.totalorder %s345_s13, %s459_s2 }
 0x195   :  { %p351_p9 = pnand %p349_p8, %p346_p7 }
 0x197   :  { %354 = shalt.err (!%p351_p9)
}
 0x198   :  { %214 = dma.vmem_to_hbm [thread:$0]  %s209_s9, 256, %s459_s2, [#allocation5], %s362_s19, %s362_s19, %s363_s20  }
 0x199   :  { %359 = dma.done.wait [#allocation5], 256  }
 0x19a   :  { %360 = vsyncadd [#allocation5], 4294967040 }
 0x19b   :  { %218 = vsyncpa [#allocation4], 1 }
 0x19c   :  { %219 = vsyncpa [#allocation7], 1 }
 0x19d   :  { %220 = vsyncpa [#allocation5], 1 }

</bundles_post_ra>
